<compile_context>
chip_gen: v7x
topology: tpu7x:2x2x1
jax: 0.10.0
libtpu: 0.0.40
codegen_flags: <defaults>
</compile_context>

<pallas_src>
import jax
import jax.numpy as jnp
from jax.experimental import pallas as pl
from jax.experimental.pallas import tpu as pltpu


def _attention_kernel(x_ref, w_ref, o_ref):
    # x_ref: (TB, S, H)   w_ref: (1, H)   o_ref: (TB, S, H)
    x = x_ref[...].astype(jnp.float32)              # cast once, reuse
    w = w_ref[...].astype(jnp.float32)              # (1, H), lane-dense row

    # Linear(hidden_dim, 1) score via VPU multiply + XLU lane-reduce
    # (instead of an N=1 MXU matmul).  Bias is omitted: it cancels in softmax.
    scores = jnp.sum(x * w[None, :, :], axis=-1, keepdims=True)   # (TB, S, 1)

    # softmax over the sequence axis (dim=1 of the (B, S, 1) score tensor)
    m = jnp.max(scores, axis=1, keepdims=True)       # (TB, 1, 1)
    e = jnp.exp(scores - m)                          # (TB, S, 1)
    denom = jnp.sum(e, axis=1, keepdims=True)        # (TB, 1, 1)
    # exact reciprocal (tiny (TB,1,1) op) to stay within 1e-5 tolerance;
    # approx=True would move it to the EUP slot at lower precision.
    weights = e * pl.reciprocal(denom, approx=False)  # (TB, S, 1)

    # x * weights, broadcasting (TB, S, 1) over the hidden (lane) dim
    o_ref[...] = (x * weights).astype(o_ref.dtype)


def _pick_batch_tile(B, S, H, itemsize, per_block_budget_bytes=2 << 20):
    """Largest divisor TB of B whose (TB, S, H) block fits the per-block budget.

    Budget is chosen so 2x double-buffered input + 2x output blocks
    (~4 * block) stay well under v5e's 16 MiB default scoped VMEM.
    """
    tb = 1
    for cand in range(1, B + 1):
        if B % cand == 0 and cand * S * H * itemsize <= per_block_budget_bytes:
            tb = cand
    return tb


def attention_forward(x, w, b=None):
    """x: (B, S, H); w: (H, 1) (torch Linear weight transposed); b: (1,).

    The bias is accepted for interface parity but not used: adding the same
    scalar to every score is a no-op under softmax over the sequence axis.
    """
    del b
    B, S, H = x.shape
    w_row = w.reshape(1, H).astype(jnp.float32)      # lane-dense (1, H) row

    tb = _pick_batch_tile(B, S, H, jnp.dtype(x.dtype).itemsize)
    # TODO(synk): for very large S*H (block > budget even at TB=1), add a
    # two-sweep S-tiled online softmax (running max/denominator in scratch).

    return pl.pallas_call(
        _attention_kernel,
        out_shape=jax.ShapeDtypeStruct((B, S, H), x.dtype),
        grid_spec=pltpu.PrefetchScalarGridSpec(
            num_scalar_prefetch=0,
            grid=(B // tb,),
            in_specs=[
                pl.BlockSpec((tb, S, H), lambda i: (i, 0, 0)),   # x batch tile
                pl.BlockSpec((1, H), lambda i: (0, 0)),          # weight row
            ],
            out_specs=pl.BlockSpec((tb, S, H), lambda i: (i, 0, 0)),
        ),
        compiler_params=pltpu.CompilerParams(
            dimension_semantics=("parallel",)),
    )(x, w_row)


def attention_reference(x, w, b):
    scores = jnp.einsum("bsh,ho->bso", x, w) + b          # (B, S, 1)
    weights = jax.nn.softmax(scores, axis=1)
    return x * weights


if __name__ == "__main__":
    key = jax.random.PRNGKey(0)
    kx, kw, kb = jax.random.split(key, 3)

    B, S, H = 2, 8, 32
    x = jax.random.normal(kx, (B, S, H), dtype=jnp.float32)

    # Deterministic parameter init mimicking nn.Linear(hidden_dim, 1):
    # weight shape (1, H) in torch -> stored here transposed as (H, 1).
    bound = 1.0 / (H ** 0.5)
    w = jax.random.uniform(kw, (H, 1), minval=-bound, maxval=bound,
                           dtype=jnp.float32)
    b = jax.random.uniform(kb, (1,), minval=-bound, maxval=bound,
                           dtype=jnp.float32)

    out = attention_forward(x, w, b)
    jax.block_until_ready(out)

    ref = attention_reference(x, w, b)
    assert out.shape == (B, S, H)
    assert jnp.allclose(out, ref, atol=1e-5, rtol=1e-5), "mismatch vs reference"

    print("KERNEL_OK")
</pallas_src>

<mosaic_0001>
module attributes {stable_mosaic.version = 11 : i64} {
  func.func @_attention_kernel(%arg0: i32, %arg1: memref<2x8x32xf32, #tpu.memory_space<vmem>>, %arg2: memref<1x32xf32, #tpu.memory_space<vmem>>, %arg3: memref<2x8x32xf32, #tpu.memory_space<vmem>>) attributes {dimension_semantics = [#tpu.dimension_semantics<parallel>], iteration_bounds = array<i64: 1>, scalar_prefetch = 0 : i64, scratch_operands = 0 : i64, tpu.core_type = #tpu.core_type<tc>, window_params = [{transform_indices = @transform_0, window_bounds = array<i64: 2, 8, 32>}, {pipeline_mode = #tpu.pipeline_mode<synchronous>, transform_indices = @transform_1, window_bounds = array<i64: 1, 32>}, {transform_indices = @transform_2, window_bounds = array<i64: 2, 8, 32>}]} {
    %c0 = arith.constant 0 : index
    %c0_0 = arith.constant 0 : index
    %c0_1 = arith.constant 0 : index
    %0 = vector.load %arg1[%c0, %c0_0, %c0_1] : memref<2x8x32xf32, #tpu.memory_space<vmem>>, vector<2x8x32xf32>
    %c0_2 = arith.constant 0 : index
    %c0_3 = arith.constant 0 : index
    %1 = vector.load %arg2[%c0_2, %c0_3] : memref<1x32xf32, #tpu.memory_space<vmem>>, vector<1x32xf32>
    %2 = vector.shape_cast %1 : vector<1x32xf32> to vector<1x1x32xf32>
    %3 = vector.broadcast %2 : vector<1x1x32xf32> to vector<2x8x32xf32>
    %4 = arith.mulf %0, %3 : vector<2x8x32xf32>
    %cst = arith.constant dense<0.000000e+00> : vector<2x8xf32>
    %5 = vector.multi_reduction <add>, %4, %cst [2] : vector<2x8x32xf32> to vector<2x8xf32>
    %6 = vector.shape_cast %5 : vector<2x8xf32> to vector<2x8x1xf32>
    %cst_4 = arith.constant dense<0xFF800000> : vector<2x1xf32>
    %7 = vector.multi_reduction <maximumf>, %6, %cst_4 [1] : vector<2x8x1xf32> to vector<2x1xf32>
    %8 = vector.shape_cast %7 : vector<2x1xf32> to vector<2x1x1xf32>
    %9 = vector.broadcast %8 : vector<2x1x1xf32> to vector<2x8x1xf32>
    %10 = arith.subf %6, %9 : vector<2x8x1xf32>
    %11 = math.exp %10 : vector<2x8x1xf32>
    %cst_5 = arith.constant dense<0.000000e+00> : vector<2x1xf32>
    %12 = vector.multi_reduction <add>, %11, %cst_5 [1] : vector<2x8x1xf32> to vector<2x1xf32>
    %13 = vector.shape_cast %12 : vector<2x1xf32> to vector<2x1x1xf32>
    %14 = tpu.reciprocal %13 : vector<2x1x1xf32> -> vector<2x1x1xf32>
    %15 = vector.broadcast %14 : vector<2x1x1xf32> to vector<2x8x1xf32>
    %16 = arith.mulf %11, %15 : vector<2x8x1xf32>
    %17 = vector.broadcast %16 : vector<2x8x1xf32> to vector<2x8x32xf32>
    %18 = arith.mulf %0, %17 : vector<2x8x32xf32>
    %c0_6 = arith.constant 0 : index
    %c0_7 = arith.constant 0 : index
    %c0_8 = arith.constant 0 : index
    %19 = vector.load %arg3[%c0_6, %c0_7, %c0_8] : memref<2x8x32xf32, #tpu.memory_space<vmem>>, vector<2x8x32xf32>
    tpu.vector_store %arg3[%c0_6, %c0_7, %c0_8], %18 {strides = array<i32>} : memref<2x8x32xf32, #tpu.memory_space<vmem>>, vector<2x8x32xf32>,
    return
  }
  func.func @transform_0(%arg0: i32) -> (i32, i32, i32) {
    %c0_i32 = arith.constant 0 : i32
    %c0_i32_0 = arith.constant 0 : i32
    %c0_i32_1 = arith.constant 0 : i32
    return %arg0, %c0_i32, %c0_i32_0 : i32, i32, i32
  }
  func.func @transform_1(%arg0: i32) -> (i32, i32) {
    %c0_i32 = arith.constant 0 : i32
    %c0_i32_0 = arith.constant 0 : i32
    %c0_i32_1 = arith.constant 0 : i32
    return %c0_i32, %c0_i32_0 : i32, i32
  }
  func.func @transform_2(%arg0: i32) -> (i32, i32, i32) {
    %c0_i32 = arith.constant 0 : i32
    %c0_i32_0 = arith.constant 0 : i32
    %c0_i32_1 = arith.constant 0 : i32
    return %arg0, %c0_i32, %c0_i32_0 : i32, i32, i32
  }
}

</mosaic_0001>

<bundles_post_ra>
// kernel: tpu_custom_call.1
= control target key start
LH: loop header
LB: loop body
LE: loop exit
PB: predicated region body
PF: predicated region fallthrough
CT: control target
= control target key end

     0   :  { %7 = vsyncpa [#allocation3], 0  ;;  %s216_s0 = inlined_call_operand.hbm [shape: f32[2,8,32], index: 0, kind: input, shape index: {}]   ;;  %s217_s1 = inlined_call_operand.vmem [shape: f32[1,32], index: 1, kind: input, shape index: {}]   ;;  %s218_s2 = inlined_call_operand.hbm [shape: f32[2,8,32], index: 2, kind: output, shape index: {}]  }
   0x1   :  { %8 = vsyncpa [#allocation4], 0  ;;  %s160_s9 = smov [#allocation2]   ;;  %s112_s13 = scalar_lea.hbm %s216_s0, 256 }
   0x2   :  { %s14_s10 = sshll.u32 %s160_s9, 4  ;;  %p113_p0 = scmp.ne.s32.totalorder %s216_s0, %s112_s13  ;;  %s15_s10 = int_to_ptr.vmem [resolvable:$true] %s14_s10 }
   0x3   :  { %p116_p1 = scmp.lt.u32.totalorder %s112_s13, %s216_s0 }
   0x5   :  { %p118_p2 = pnand %p116_p1, %p113_p0 }
   0x7   :  { %121 = shalt.err (!%p118_p2)
}
   0x8   :  { %s122_s18 = scalar_lea.vmem %s15_s10, 256  ;;  %p127_p4 = scmp.lt.s32.totalorder %s15_s10, %s15_s10 }
   0x9   :  { %p123_p3 = scmp.ne.s32.totalorder %s15_s10, %s122_s18  ;;  %p128_p5 = scmp.lt.s32.totalorder %s122_s18, %s122_s18 }
   0xb   :  { %p129_p6 = por %p128_p5, %p127_p4 }
   0xd   :  { %p130_p7 = pnand %p129_p6, %p123_p3 }
   0xf   :  { %133 = shalt.err (!%p130_p7)
}
  0x10   :  { %s161_s19 = smov 128   ;;  %s162_s20 = smov 8  }
  0x11   :  { %20 = dma.hbm_to_vmem [thread:$0]  %s216_s0, 256, %s15_s10, [#allocation3], %s161_s19, %s161_s19, %s162_s20  }
  0x12   :  { %156 = dma.done.wait [#allocation3], 256  }
  0x13   :  { %157 = vsyncadd [#allocation3], 4294967040  ;;  %v26_v0 = vld [vmem:[#allocation2] sm:$0xff]  ;;  %vm37_vm0 = vcmask 261120   ;;  %v27_v2 = vld [vmem:[#allocation2 + $0x8] sm:$0xff]  ;;  %s163_s0 = smov [#allocation5]  }
  0x14   :  { %v99_v1 = vld [vmem:[%s217_s1] ss:$0 sm:$0xff]  ;;  %s87_s1 = sshll.u32 %s163_s0, 4  ;;  %s88_s1 = int_to_ptr.vmem [resolvable:$true] %s87_s1 }
  0x15   :  { %v35_v3 = vmul.f32 %v99_v1, %v26_v0  ;;  %v36_v4 = vmul.f32 %v99_v1, %v27_v2  ;;  %s134_s25 = scalar_lea.vmem %s88_s1, 256  ;;  %p139_p9 = scmp.lt.s32.totalorder %s88_s1, %s88_s1 }
  0x16   :  { %p135_p8 = scmp.ne.s32.totalorder %s88_s1, %s134_s25  ;;  %p140_p10 = scmp.lt.s32.totalorder %s134_s25, %s134_s25 }
  0x17   :  { %v38_v5 = vsel %vm37_vm0, %v35_v3, 0.0  ;;  %v41_v6 = vsel %vm37_vm0, %v36_v4, 0.0 }
  0x18   :  { %39 = vadd.xlane.f32.xlu0 %v38_v5  ;;  %p141_p11 = por %p140_p10, %p139_p9 }
  0x1a   :  { %p142_p12 = pnand %p141_p11, %p135_p8 }
  0x1c   :  { %42 = vadd.xlane.f32.xlu0 %v41_v6 }
  0xa5   :  { %v40_v7 = vpop.xlane.xlu0 %39 }
  0xa6   :  { %v44_v8 = vrot.slane %v40_v7, 4 }
  0xa8   :  { %v45_v9 = vmax.f32 %v40_v7, %v44_v8 }
  0xa9   :  { %v43_v10 = vpop.xlane.xlu0 %42 }
  0xaa   :  { %v46_v11 = vrot.slane %v45_v9, 2  ;;  %v50_v12 = vrot.slane %v43_v10, 4 }
  0xac   :  { %v47_v13 = vmax.f32 %v45_v9, %v46_v11  ;;  %v51_v14 = vmax.f32 %v43_v10, %v50_v12 }
  0xae   :  { %v48_v15 = vrot.slane %v47_v13, 1  ;;  %v52_v16 = vrot.slane %v51_v14, 2 }
  0xb0   :  { %v49_v17 = vmax.f32 %v47_v13, %v48_v15  ;;  %v53_v18 = vmax.f32 %v51_v14, %v52_v16 }
  0xb2   :  { %v56_v19 = vsub.f32 %v40_v7, %v49_v17  ;;  %v54_v20 = vrot.slane %v53_v18, 1 }
  0xb4   :  { %v58_v21 = vmul.f32 1.442695, %v56_v19  ;;  %v55_v22 = vmax.f32 %v53_v18, %v54_v20 }
  0xb6   :  { %104 = vpow2.f32 %v58_v21  ;;  %v57_v23 = vsub.f32 %v43_v10, %v55_v22 }
  0xb8   :  { %v60_v24 = vmul.f32 1.442695, %v57_v23 }
  0xba   :  { %106 = vpow2.f32 %v60_v24 }
  0xc0   :  { %v105_v25 = vpop.eup %104 }
  0xc1   :  { %v62_v26 = vrot.slane %v105_v25, 4 }
  0xc3   :  { %v63_v27 = vadd.f32 %v105_v25, %v62_v26 }
  0xc4   :  { %v107_v28 = vpop.eup %106 }
  0xc5   :  { %v64_v29 = vrot.slane %v63_v27, 2  ;;  %v68_v30 = vrot.slane %v107_v28, 4 }
  0xc7   :  { %v65_v31 = vadd.f32 %v64_v29, %v63_v27  ;;  %v69_v32 = vadd.f32 %v107_v28, %v68_v30 }
  0xc9   :  { %v66_v33 = vrot.slane %v65_v31, 1  ;;  %v70_v34 = vrot.slane %v69_v32, 2 }
  0xcb   :  { %v67_v35 = vadd.f32 %v66_v33, %v65_v31  ;;  %v71_v36 = vadd.f32 %v70_v34, %v69_v32 }
  0xcd   :  { %v72_v37 = vrot.slane %v71_v36, 1  ;;  %108 = vrcp.f32 %v67_v35 }
  0xcf   :  { %v73_v38 = vadd.f32 %v72_v37, %v71_v36 }
  0xd1   :  { %110 = vrcp.f32 %v73_v38 }
  0xd7   :  { %v109_v39 = vpop.eup %108 }
  0xd8   :  { %v76_v40 = vmul.f32 %v109_v39, %v105_v25 }
  0xda   :  { %v78_v41 = vmul.f32 %v76_v40, %v26_v0 }
  0xdb   :  { %v111_v42 = vpop.eup %110 }
  0xdc   :  { %v77_v43 = vmul.f32 %v111_v42, %v107_v28  ;;  %80 = vst.msk [vmem:[#allocation5] sm:$0xff] %vm37_vm0, %v78_v41 }
  0xde   :  { %v79_v44 = vmul.f32 %v77_v43, %v27_v2 }
  0xe0   :  { %81 = vst.msk [vmem:[#allocation5 + $0x8] sm:$0xff] %vm37_vm0, %v79_v44 }
  0xe1   :  { %145 = shalt.err (!%p142_p12)
}
  0xe2   :  { %s146_s28 = scalar_lea.hbm %s218_s2, 256 }
  0xe3   :  { %p147_p13 = scmp.ne.s32.totalorder %s218_s2, %s146_s28  ;;  %p150_p0 = scmp.lt.u32.totalorder %s146_s28, %s218_s2 }
  0xe5   :  { %p152_p1 = pnand %p150_p0, %p147_p13 }
  0xe7   :  { %155 = shalt.err (!%p152_p1)
}
  0xe8   :  { %93 = dma.vmem_to_hbm [thread:$0]  %s88_s1, 256, %s218_s2, [#allocation4], %s161_s19, %s161_s19, %s162_s20  }
  0xe9   :  { %158 = dma.done.wait [#allocation4], 256  }
  0xea   :  { %159 = vsyncadd [#allocation4], 4294967040 }
  0xeb   :  { %97 = vsyncpa [#allocation3], 1 }
  0xec   :  { %98 = vsyncpa [#allocation4], 1 }

</bundles_post_ra>
